<compile_context>
chip_gen: v5e
topology: v5e:2x2
jax: 0.10.0
libtpu: 0.0.40
codegen_flags: <defaults>
</compile_context>

<pallas_src>
import jax
import jax.numpy as jnp
from jax.experimental import pallas as pl
from jax.experimental.pallas import tpu as pltpu

LANE = 128
_VMEM_TILE_BUDGET = 24 << 20   # tile-selection budget: fits v7x 32 MiB scoped default
_VMEM_LIMIT_CAP = 48 << 20     # never approach v7x's 64 MiB physical VMEM


def _round_up(x, m):
    return ((x + m - 1) // m) * m


# ---------------------------------------------------------------------------
# Pallas kernel
# ---------------------------------------------------------------------------
def _elu(h):
    # ELU(alpha=1): h if h > 0 else exp(h) - 1   (min() guards exp overflow)
    return jnp.where(h > 0.0, h, jnp.exp(jnp.minimum(h, 0.0)) - 1.0)


def _make_mlp_kernel(n_linear):
    """Fused MLP kernel: n_linear matmuls, ELU after every layer but the last."""

    def kernel(*refs):
        x_ref, o_ref = refs[0], refs[-1]
        wb = refs[1:-1]  # w0, b0, w1, b1, ...
        h = x_ref[...].astype(jnp.float32)
        for i in range(n_linear):                 # static unroll
            w = wb[2 * i][...]                    # bf16 (in, out), zero-padded
            b = wb[2 * i + 1][...]                # f32  (1, out)
            h = jnp.dot(h.astype(jnp.bfloat16), w,
                        preferred_element_type=jnp.float32) + b
            if i < n_linear - 1:
                h = _elu(h)                       # f32 VPU/EUP math (v5e-safe)
        o_ref[...] = h.astype(o_ref.dtype)

    return kernel


# ---------------------------------------------------------------------------
# VMEM-aware tiling
# ---------------------------------------------------------------------------
def _vmem_footprint_bytes(tm, K, N, ws, bs):
    x_bytes = 2 * tm * K * 4                       # double-buffered input tile (f32)
    out_bytes = 2 * tm * N * 4                     # double-buffered output tile (f32)
    wb_bytes = sum(int(w.size) * w.dtype.itemsize for w in ws) \
             + sum(int(b.size) * b.dtype.itemsize for b in bs)  # single-buffered
    widths = [K] + [int(w.shape[1]) for w in ws]
    act_bytes = 2 * tm * max(widths) * 4           # live f32 activations
    return x_bytes + out_bytes + wb_bytes + act_bytes


def _pick_row_tile(M, K, N, ws, bs, budget=_VMEM_TILE_BUDGET):
    m8 = _round_up(max(M, 8), 8)
    # Keep >=2 grid steps when there is enough work (pipelining + v7x megacore).
    cap = m8 if m8 < 16 else _round_up(m8 // 2, 8)
    for cand in (2048, 1024, 512, 256, 128, 64, 32, 16, 8):
        if cand <= cap and _vmem_footprint_bytes(cand, K, N, ws, bs) <= budget:
            return cand
    return 8


def _mlp_pallas(x2d, ws, bs):
    """x2d: (M, K); ws[i]: bf16 (d_i, d_{i+1}); bs[i]: f32 (1, d_{i+1}).
    Returns (M_pad, N) f32; caller slices rows / output columns."""
    M, K = x2d.shape
    N = int(ws[-1].shape[1])
    n_linear = len(ws)

    tm = _pick_row_tile(M, K, N, ws, bs)
    M_pad = _round_up(M, tm)
    if M_pad != M:
        x2d = jnp.pad(x2d, ((0, M_pad - M), (0, 0)))
    grid = (M_pad // tm,)

    in_specs = [pl.BlockSpec((tm, K), lambda i: (i, 0))]
    args = [x2d]
    const_map = lambda i: (0, 0)
    for w, b in zip(ws, bs):
        # Constant index_map -> DMA'd once; single-buffer to halve resident VMEM.
        in_specs.append(pl.BlockSpec(w.shape, const_map,
                                     pipeline_mode=pl.Buffered(buffer_count=1)))
        in_specs.append(pl.BlockSpec(b.shape, const_map,
                                     pipeline_mode=pl.Buffered(buffer_count=1)))
        args.extend([w, b])

    footprint = _vmem_footprint_bytes(tm, K, N, ws, bs)
    vmem_limit = int(min(_VMEM_LIMIT_CAP, max(32 << 20, 2 * footprint + (2 << 20))))

    widths = [K] + [int(w.shape[1]) for w in ws]
    flops = 2 * M_pad * sum(widths[i] * widths[i + 1] for i in range(n_linear))
    transcend = M_pad * sum(widths[1:-1])
    bytes_acc = (M_pad * K * 4 + M_pad * N * 4
                 + sum(int(w.size) * w.dtype.itemsize for w in ws)
                 + sum(int(b.size) * b.dtype.itemsize for b in bs))

    return pl.pallas_call(
        _make_mlp_kernel(n_linear),
        out_shape=jax.ShapeDtypeStruct((M_pad, N), jnp.float32),
        grid=grid,
        in_specs=in_specs,
        out_specs=pl.BlockSpec((tm, N), lambda i: (i, 0)),
        compiler_params=pltpu.CompilerParams(
            dimension_semantics=("parallel",),
            vmem_limit_bytes=vmem_limit),
        cost_estimate=pl.CostEstimate(
            flops=flops, transcendentals=transcend, bytes_accessed=bytes_acc),
    )(*args)


# ---------------------------------------------------------------------------
# Parameter prep (hoisted out of the per-call path) + jitted forward
# ---------------------------------------------------------------------------
def prepare_params(params):
    """torch (out,in) -> (in,out); zero-pad all widths to LANE multiples; bf16 weights.

    Padding is exact: padded biases are 0 and ELU(0) = 0, and padded input rows
    of the next weight are 0, so padded lanes never contribute.
    """
    ws = [params["w_first"]] + list(params["w_layers"]) + [params["w_last"]]
    bs = [params["b_first"]] + list(params["b_layers"]) + [params["b_last"]]
    ws = [jnp.asarray(w, jnp.float32).T for w in ws]   # (in, out)
    bs = [jnp.asarray(b, jnp.float32) for b in bs]

    new_ws, new_bs = [], []
    for w, b in zip(ws, bs):
        in_d, out_d = int(w.shape[0]), int(w.shape[1])
        in_p, out_p = _round_up(in_d, LANE), _round_up(out_d, LANE)
        w = jnp.pad(w, ((0, in_p - in_d), (0, out_p - out_d)))
        b = jnp.pad(b, (0, out_p - out_d))
        new_ws.append(w.astype(jnp.bfloat16))
        new_bs.append(b.reshape(1, -1).astype(jnp.float32))
    return {"ws": tuple(new_ws), "bs": tuple(new_bs)}


@jax.jit
def f_nn_forward(y, prepared):
    """y: (B, D1, D2, D3) -> (B, D1, D2 - 1, D3), matching F_NN.forward."""
    B, D1, D2, D3 = y.shape
    out_dim = (D2 - 1) * D3
    x2d = y.reshape(B * D1, D2 * D3).astype(jnp.float32)   # flatten(-2, -1)
    K_pad = int(prepared["ws"][0].shape[0])
    if x2d.shape[1] < K_pad:                                # pad input features if needed
        x2d = jnp.pad(x2d, ((0, 0), (0, K_pad - x2d.shape[1])))
    out = _mlp_pallas(x2d, prepared["ws"], prepared["bs"])  # (M_pad, N_pad)
    out = out[:B * D1, :out_dim]                            # drop row/col padding
    return out.reshape(B, D1, D2 - 1, D3)                   # .view(...)


# ---------------------------------------------------------------------------
# Pure-JAX reference (correctness check, f32 everywhere)
# ---------------------------------------------------------------------------
def reference_forward(y, params):
    B, D1, D2, D3 = y.shape
    h = y.reshape(B, D1, D2 * D3)
    h = jax.nn.elu(h @ params["w_first"].T + params["b_first"])
    for w, b in zip(params["w_layers"], params["b_layers"]):
        h = jax.nn.elu(h @ w.T + b)
    h = h @ params["w_last"].T + params["b_last"]
    return h.reshape(B, D1, D2 - 1, D3)


# ---------------------------------------------------------------------------
# Deterministic PyTorch-style init: uniform(-1/sqrt(fan_in), 1/sqrt(fan_in))
# ---------------------------------------------------------------------------
def init_params(key, in_dim, out_dim, shapes):
    dims = [in_dim] + list(shapes) + [out_dim]
    n = len(dims) - 1
    keys = jax.random.split(key, 2 * n)

    def u(k, shape, fan_in):
        bound = 1.0 / (float(fan_in) ** 0.5)
        return jax.random.uniform(k, shape, jnp.float32, -bound, bound)

    w_list, b_list = [], []
    for i in range(n):
        w_list.append(u(keys[2 * i], (dims[i + 1], dims[i]), dims[i]))  # torch (out, in)
        b_list.append(u(keys[2 * i + 1], (dims[i + 1],), dims[i]))
    return {
        "w_first": w_list[0], "b_first": b_list[0],
        "w_layers": tuple(w_list[1:-1]), "b_layers": tuple(b_list[1:-1]),
        "w_last": w_list[-1], "b_last": b_list[-1],
    }


if __name__ == "__main__":
    key = jax.random.PRNGKey(0)
    kx, kp = jax.random.split(key)

    # F_NN shape constraint: out_dim must equal (D2 - 1) * D3 for the final view.
    B, D1, D2, D3 = 2, 4, 16, 16
    in_dim = D2 * D3            # 256 (flatten of last two dims)
    out_dim = (D2 - 1) * D3     # 240 (padded to 256 inside the kernel)
    shapes = (64, 64)           # hidden widths (padded to 128 inside the kernel)

    params = init_params(kp, in_dim, out_dim, shapes)
    prepared = prepare_params(params)
    y = jax.random.normal(kx, (B, D1, D2, D3), dtype=jnp.float32)

    out = jax.block_until_ready(f_nn_forward(y, prepared))
    ref = jax.block_until_ready(reference_forward(y, params))

    assert out.shape == ref.shape == (B, D1, D2 - 1, D3), out.shape
    # bf16 matmul operands with f32 accumulation -> loosened tolerances.
    assert jnp.allclose(out, ref, atol=5e-2, rtol=5e-2), \
        float(jnp.max(jnp.abs(out - ref)))

    print("KERNEL_OK")
</pallas_src>

<mosaic_0001>
module attributes {stable_mosaic.version = 11 : i64} {
  func.func @kernel(%arg0: i32, %arg1: memref<8x256xf32, #tpu.memory_space<vmem>>, %arg2: memref<256x128xbf16, #tpu.memory_space<vmem>>, %arg3: memref<1x128xf32, #tpu.memory_space<vmem>>, %arg4: memref<128x128xbf16, #tpu.memory_space<vmem>>, %arg5: memref<1x128xf32, #tpu.memory_space<vmem>>, %arg6: memref<128x256xbf16, #tpu.memory_space<vmem>>, %arg7: memref<1x256xf32, #tpu.memory_space<vmem>>, %arg8: memref<8x256xf32, #tpu.memory_space<vmem>>) attributes {dimension_semantics = [#tpu.dimension_semantics<parallel>], iteration_bounds = array<i64: 1>, scalar_prefetch = 0 : i64, scratch_operands = 0 : i64, tpu.core_type = #tpu.core_type<tc>, window_params = [{transform_indices = @transform_0, window_bounds = array<i64: 8, 256>}, {pipeline_mode = #tpu.pipeline_mode<synchronous>, transform_indices = @transform_1, window_bounds = array<i64: 256, 128>}, {pipeline_mode = #tpu.pipeline_mode<synchronous>, transform_indices = @transform_2, window_bounds = array<i64: 1, 128>}, {pipeline_mode = #tpu.pipeline_mode<synchronous>, transform_indices = @transform_3, window_bounds = array<i64: 128, 128>}, {pipeline_mode = #tpu.pipeline_mode<synchronous>, transform_indices = @transform_4, window_bounds = array<i64: 1, 128>}, {pipeline_mode = #tpu.pipeline_mode<synchronous>, transform_indices = @transform_5, window_bounds = array<i64: 128, 256>}, {pipeline_mode = #tpu.pipeline_mode<synchronous>, transform_indices = @transform_6, window_bounds = array<i64: 1, 256>}, {transform_indices = @transform_7, window_bounds = array<i64: 8, 256>}]} {
    %c0 = arith.constant 0 : index
    %c0_0 = arith.constant 0 : index
    %0 = vector.load %arg1[%c0, %c0_0] : memref<8x256xf32, #tpu.memory_space<vmem>>, vector<8x256xf32>
    %c0_1 = arith.constant 0 : index
    %c0_2 = arith.constant 0 : index
    %1 = vector.load %arg2[%c0_1, %c0_2] : memref<256x128xbf16, #tpu.memory_space<vmem>>, vector<256x128xbf16>
    %c0_3 = arith.constant 0 : index
    %c0_4 = arith.constant 0 : index
    %2 = vector.load %arg3[%c0_3, %c0_4] : memref<1x128xf32, #tpu.memory_space<vmem>>, vector<1x128xf32>
    %3 = arith.truncf %0 : vector<8x256xf32> to vector<8x256xbf16>
    %cst = arith.constant dense<0.000000e+00> : vector<8x128xf32>
    %4 = tpu.matmul %3, %1, %cst {dimension_numbers = #tpu.dot_dimension_numbers<[1], [0], [0], [1], [0, 0, 1, 1], [], []>} : vector<8x256xbf16>, vector<256x128xbf16>, vector<8x128xf32> -> vector<8x128xf32>
    %5 = vector.broadcast %2 : vector<1x128xf32> to vector<8x128xf32>
    %6 = arith.addf %4, %5 : vector<8x128xf32>
    %cst_5 = arith.constant 0.000000e+00 : f32
    %7 = vector.broadcast %cst_5 : f32 to vector<8x128xf32>
    %8 = arith.cmpf ogt, %6, %7 : vector<8x128xf32>
    %cst_6 = arith.constant 0.000000e+00 : f32
    %9 = vector.broadcast %cst_6 : f32 to vector<8x128xf32>
    %10 = arith.minimumf %6, %9 : vector<8x128xf32>
    %11 = math.exp %10 : vector<8x128xf32>
    %cst_7 = arith.constant 1.000000e+00 : f32
    %12 = vector.broadcast %cst_7 : f32 to vector<8x128xf32>
    %13 = arith.subf %11, %12 : vector<8x128xf32>
    %14 = arith.select %8, %6, %13 : vector<8x128xi1>, vector<8x128xf32>
    %c0_8 = arith.constant 0 : index
    %c0_9 = arith.constant 0 : index
    %15 = vector.load %arg4[%c0_8, %c0_9] : memref<128x128xbf16, #tpu.memory_space<vmem>>, vector<128x128xbf16>
    %c0_10 = arith.constant 0 : index
    %c0_11 = arith.constant 0 : index
    %16 = vector.load %arg5[%c0_10, %c0_11] : memref<1x128xf32, #tpu.memory_space<vmem>>, vector<1x128xf32>
    %17 = arith.truncf %14 : vector<8x128xf32> to vector<8x128xbf16>
    %cst_12 = arith.constant dense<0.000000e+00> : vector<8x128xf32>
    %18 = tpu.matmul %17, %15, %cst_12 {dimension_numbers = #tpu.dot_dimension_numbers<[1], [0], [0], [1], [0, 0, 1, 1], [], []>} : vector<8x128xbf16>, vector<128x128xbf16>, vector<8x128xf32> -> vector<8x128xf32>
    %19 = vector.broadcast %16 : vector<1x128xf32> to vector<8x128xf32>
    %20 = arith.addf %18, %19 : vector<8x128xf32>
    %cst_13 = arith.constant 0.000000e+00 : f32
    %21 = vector.broadcast %cst_13 : f32 to vector<8x128xf32>
    %22 = arith.cmpf ogt, %20, %21 : vector<8x128xf32>
    %cst_14 = arith.constant 0.000000e+00 : f32
    %23 = vector.broadcast %cst_14 : f32 to vector<8x128xf32>
    %24 = arith.minimumf %20, %23 : vector<8x128xf32>
    %25 = math.exp %24 : vector<8x128xf32>
    %cst_15 = arith.constant 1.000000e+00 : f32
    %26 = vector.broadcast %cst_15 : f32 to vector<8x128xf32>
    %27 = arith.subf %25, %26 : vector<8x128xf32>
    %28 = arith.select %22, %20, %27 : vector<8x128xi1>, vector<8x128xf32>
    %c0_16 = arith.constant 0 : index
    %c0_17 = arith.constant 0 : index
    %29 = vector.load %arg6[%c0_16, %c0_17] : memref<128x256xbf16, #tpu.memory_space<vmem>>, vector<128x256xbf16>
    %c0_18 = arith.constant 0 : index
    %c0_19 = arith.constant 0 : index
    %30 = vector.load %arg7[%c0_18, %c0_19] : memref<1x256xf32, #tpu.memory_space<vmem>>, vector<1x256xf32>
    %31 = arith.truncf %28 : vector<8x128xf32> to vector<8x128xbf16>
    %cst_20 = arith.constant dense<0.000000e+00> : vector<8x256xf32>
    %32 = tpu.matmul %31, %29, %cst_20 {dimension_numbers = #tpu.dot_dimension_numbers<[1], [0], [0], [1], [0, 0, 1, 1], [], []>} : vector<8x128xbf16>, vector<128x256xbf16>, vector<8x256xf32> -> vector<8x256xf32>
    %33 = vector.broadcast %30 : vector<1x256xf32> to vector<8x256xf32>
    %34 = arith.addf %32, %33 : vector<8x256xf32>
    %c0_21 = arith.constant 0 : index
    %c0_22 = arith.constant 0 : index
    %35 = vector.load %arg8[%c0_21, %c0_22] : memref<8x256xf32, #tpu.memory_space<vmem>>, vector<8x256xf32>
    tpu.vector_store %arg8[%c0_21, %c0_22], %34 {strides = array<i32>} : memref<8x256xf32, #tpu.memory_space<vmem>>, vector<8x256xf32>,
    return
  }
  func.func @transform_0(%arg0: i32) -> (i32, i32) {
    %c0_i32 = arith.constant 0 : i32
    %c0_i32_0 = arith.constant 0 : i32
    return %arg0, %c0_i32 : i32, i32
  }
  func.func @transform_1(%arg0: i32) -> (i32, i32) {
    %c0_i32 = arith.constant 0 : i32
    %c0_i32_0 = arith.constant 0 : i32
    %c0_i32_1 = arith.constant 0 : i32
    return %c0_i32, %c0_i32_0 : i32, i32
  }
  func.func @transform_2(%arg0: i32) -> (i32, i32) {
    %c0_i32 = arith.constant 0 : i32
    %c0_i32_0 = arith.constant 0 : i32
    %c0_i32_1 = arith.constant 0 : i32
    return %c0_i32, %c0_i32_0 : i32, i32
  }
  func.func @transform_3(%arg0: i32) -> (i32, i32) {
    %c0_i32 = arith.constant 0 : i32
    %c0_i32_0 = arith.constant 0 : i32
    %c0_i32_1 = arith.constant 0 : i32
    return %c0_i32, %c0_i32_0 : i32, i32
  }
  func.func @transform_4(%arg0: i32) -> (i32, i32) {
    %c0_i32 = arith.constant 0 : i32
    %c0_i32_0 = arith.constant 0 : i32
    %c0_i32_1 = arith.constant 0 : i32
    return %c0_i32, %c0_i32_0 : i32, i32
  }
  func.func @transform_5(%arg0: i32) -> (i32, i32) {
    %c0_i32 = arith.constant 0 : i32
    %c0_i32_0 = arith.constant 0 : i32
    %c0_i32_1 = arith.constant 0 : i32
    return %c0_i32, %c0_i32_0 : i32, i32
  }
  func.func @transform_6(%arg0: i32) -> (i32, i32) {
    %c0_i32 = arith.constant 0 : i32
    %c0_i32_0 = arith.constant 0 : i32
    %c0_i32_1 = arith.constant 0 : i32
    return %c0_i32, %c0_i32_0 : i32, i32
  }
  func.func @transform_7(%arg0: i32) -> (i32, i32) {
    %c0_i32 = arith.constant 0 : i32
    %c0_i32_0 = arith.constant 0 : i32
    return %arg0, %c0_i32 : i32, i32
  }
}

</mosaic_0001>

<bundles_post_ra>
// kernel: f_nn_forward.1
= control target key start
LH: loop header
LB: loop body
LE: loop exit
PB: predicated region body
PF: predicated region fallthrough
CT: control target
= control target key end

     0   :  { %12 = vsyncpa [#allocation3], 0  ;;  %s838_s0 = inlined_call_operand.vmem [shape: f32[8,256], index: 0, kind: input, shape index: {}]   ;;  %s839_s1 = inlined_call_operand.vmem [shape: bf16[256,128], index: 1, kind: input, shape index: {}]   ;;  %s840_s2 = inlined_call_operand.vmem [shape: f32[1,128], index: 2, kind: input, shape index: {}]   ;;  %s841_s3 = inlined_call_operand.hbm [shape: bf16[128,128], index: 3, kind: input, shape index: {}]   ;;  %s842_s4 = inlined_call_operand.vmem [shape: f32[1,128], index: 4, kind: input, shape index: {}]   ;;  %s843_s5 = inlined_call_operand.hbm [shape: bf16[128,256], index: 5, kind: input, shape index: {}]   ;;  %s844_s6 = inlined_call_operand.vmem [shape: f32[1,256], index: 6, kind: input, shape index: {}]   ;;  %s845_s7 = inlined_call_operand.vmem [shape: f32[8,256], index: 7, kind: output, shape index: {}]  }
   0x1   :  { %s24_s26 = sshll.u32 %s841_s3, 4  ;;  %s25_s26 = int_to_ptr.hbm [resolvable:$true] %s24_s26 }
   0x2   :  { %13 = vsyncpa [#allocation5], 0  ;;  %s717_s27 = smov [#allocation2]   ;;  %s39_s8 = sshll.u32 %s843_s5, 4  ;;  %s40_s8 = int_to_ptr.hbm [resolvable:$true] %s39_s8 }
   0x3   :  { %s26_s28 = sshll.u32 %s717_s27, 4  ;;  %s718_s9 = smov 64   ;;  %s27_s28 = int_to_ptr.vmem [resolvable:$true] %s26_s28 }
   0x4   :  { %s719_s10 = smov 4   ;;  %s720_s11 = smov [#allocation4]  }
   0x5   :  { %32 = dma.hbm_to_vmem [thread:$0]  %s25_s26, 1024, %s27_s28, [#allocation3], %s718_s9, %s718_s9, %s719_s10  }
   0x6   :  { %s41_s12 = sshll.u32 %s720_s11, 4  ;;  %s721_s13 = smov 128   ;;  %s42_s12 = int_to_ptr.vmem [resolvable:$true] %s41_s12 }
   0x7   :  { %s722_s14 = smov 8  }
   0x8   :  { %47 = dma.hbm_to_vmem [thread:$0]  %s40_s8, 2048, %s42_s12, [#allocation5], %s721_s13, %s721_s13, %s722_s14  }
   0x9   :  { %713 = dma.done.wait [#allocation3], 1024  }
   0xa   :  { %714 = vsyncadd [#allocation3], 4294966272 }
   0xb   :  { %715 = dma.done.wait [#allocation5], 2048  }
   0xc   :  { %716 = vsyncadd [#allocation5], 4294965248  ;;  %v620_v0 = vld [vmem:[%s839_s1 + $0x38] sm:$0xff]  ;;  %v619_v2 = vld [vmem:[%s839_s1 + $0x30] sm:$0xff] }
   0xd   :  { %v628_v1 = vld [vmem:[%s839_s1 + $0x78] sm:$0xff]  ;;  %194 = vmatpush.bf16.msra.mxu0 %v620_v0  ;;  %v627_v3 = vld [vmem:[%s839_s1 + $0x70] sm:$0xff]  ;;  %v618_v4 = vld [vmem:[%s839_s1 + $0x28] sm:$0xff] }
   0xe   :  { %207 = vmatpush.bf16.msra.mxu1 %v628_v1  ;;  %v626_v5 = vld [vmem:[%s839_s1 + $0x68] sm:$0xff]  ;;  %v636_v6 = vld [vmem:[#allocation2 + $0x38] sm:$0xff]  ;;  %v635_v7 = vld [vmem:[#allocation2 + $0x30] sm:$0xff] }
   0xf   :  { %295 = vmatpush.bf16.msra.mxu2 %v636_v6  ;;  %v617_v8 = vld [vmem:[%s839_s1 + $0x20] sm:$0xff]  ;;  %v634_v10 = vld [vmem:[#allocation2 + $0x28] sm:$0xff]  ;;  %v616_v11 = vld [vmem:[%s839_s1 + $0x18] sm:$0xff] }
  0x10   :  { %v625_v9 = vld [vmem:[%s839_s1 + $0x60] sm:$0xff]  ;;  %v624_v12 = vld [vmem:[%s839_s1 + $0x58] sm:$0xff]  ;;  %v615_v13 = vld [vmem:[%s839_s1 + $0x10] sm:$0xff] }
  0x11   :  { %195 = vmatpush.bf16.msra.mxu0 %v619_v2  ;;  %v623_v14 = vld [vmem:[%s839_s1 + $0x50] sm:$0xff]  ;;  %v614_v15 = vld [vmem:[%s839_s1 + $0x8] sm:$0xff]  ;;  %v613_v17 = vld [vmem:[%s839_s1] sm:$0xff] }
  0x12   :  { %208 = vmatpush.bf16.msra.mxu1 %v627_v3  ;;  %v622_v16 = vld [vmem:[%s839_s1 + $0x48] sm:$0xff]  ;;  %v621_v18 = vld [vmem:[%s839_s1 + $0x40] sm:$0xff]  ;;  %v632_v24 = vld [vmem:[#allocation2 + $0x18] sm:$0xff] }
  0x13   :  { %296 = vmatpush.bf16.msra.mxu2 %v635_v7  ;;  %v58_v19 = vld [vmem:[%s838_s0] sm:$0xff]  ;;  %v59_v20 = vld [vmem:[%s838_s0 + $0x8] sm:$0xff]  ;;  %v631_v25 = vld [vmem:[#allocation2 + $0x10] sm:$0xff] }
  0x14   :  { %v93_v21 = vpack.c.bf16 %v58_v19, %v58_v19  ;;  %v94_v22 = vpack.c.bf16 %v59_v20, %v59_v20  ;;  %v633_v23 = vld [vmem:[#allocation2 + $0x20] sm:$0xff]  ;;  %v630_v26 = vld [vmem:[#allocation2 + $0x8] sm:$0xff]  ;;  %v607_v28 = vld [vmem:[#allocation4 + $0x70] sm:$0xf] }
  0x15   :  { %196 = vmatpush.bf16.msra.mxu0 %v618_v4  ;;  %v629_v27 = vld [vmem:[#allocation2] sm:$0xff]  ;;  %v652_v29 = vld [vmem:[#allocation4 + $0x74] sm:$0xf0]  ;;  %v651_v30 = vld [vmem:[#allocation4 + $0x74] sm:$0xf] }
  0x16   :  { %209 = vmatpush.bf16.msra.mxu1 %v626_v5  ;;  %v608_v31 = vor.u32 %v652_v29, %v607_v28  ;;  %v609_v32 = vld [vmem:[#allocation4 + $0x78] sm:$0xf0]  ;;  %v599_v33 = vld [vmem:[#allocation4 + $0x60] sm:$0xf]  ;;  %v650_v34 = vld [vmem:[#allocation4 + $0x64] sm:$0xf0] }
  0x17   :  { %297 = vmatpush.bf16.msra.mxu2 %v634_v10  ;;  %v612_v35 = vor.u32 %v651_v30, %v609_v32  ;;  %v649_v36 = vld [vmem:[#allocation4 + $0x64] sm:$0xf]  ;;  %v601_v37 = vld [vmem:[#allocation4 + $0x68] sm:$0xf0]  ;;  %v600_v38 = vor.u32 %v650_v34, %v599_v33  ;;  %v591_v40 = vld [vmem:[#allocation4 + $0x50] sm:$0xf] }
  0x18   :  { %417 = vmatpush.bf16.msra.mxu3 %v608_v31  ;;  %v604_v39 = vor.u32 %v649_v36, %v601_v37  ;;  %v648_v41 = vld [vmem:[#allocation4 + $0x54] sm:$0xf0]  ;;  %v647_v42 = vld [vmem:[#allocation4 + $0x54] sm:$0xf]  ;;  %v593_v43 = vld [vmem:[#allocation4 + $0x58] sm:$0xf0] }
  0x19   :  { %197 = vmatpush.bf16.msra.mxu0 %v617_v8  ;;  %v592_v44 = vor.u32 %v648_v41, %v591_v40  ;;  %v659_v45 = vld [vmem:[%s840_s2] ss:$0 sm:$0xff]  ;;  %v596_v46 = vor.u32 %v647_v42, %v593_v43  ;;  %v646_v60 = vld [vmem:[#allocation4 + $0x44] sm:$0xf0]  ;;  %v645_v61 = vld [vmem:[#allocation4 + $0x44] sm:$0xf] }
  0x1a   :  { %210 = vmatpush.bf16.msra.mxu1 %v625_v9  ;;  %v583_v59 = vld [vmem:[#allocation4 + $0x40] sm:$0xf]  ;;  %v585_v63 = vld [vmem:[#allocation4 + $0x48] sm:$0xf0]  ;;  %v575_v1 = vld [vmem:[#allocation4 + $0x30] sm:$0xf] }
  0x1b   :  { %298 = vmatpush.bf16.msra.mxu2 %v633_v23  ;;  %v584_v62 = vor.u32 %v646_v60, %v583_v59  ;;  %v588_v0 = vor.u32 %v645_v61, %v585_v63  ;;  %v644_v2 = vld [vmem:[#allocation4 + $0x34] sm:$0xf0]  ;;  %v643_v3 = vld [vmem:[#allocation4 + $0x34] sm:$0xf]  ;;  %v577_v5 = vld [vmem:[#allocation4 + $0x38] sm:$0xf0] }
  0x1c   :  { %418 = vmatpush.bf16.msra.mxu3 %v600_v38  ;;  %v576_v4 = vor.u32 %v644_v2, %v575_v1  ;;  %v580_v6 = vor.u32 %v643_v3, %v577_v5  ;;  %v567_v7 = vld [vmem:[#allocation4 + $0x20] sm:$0xf]  ;;  %v642_v8 = vld [vmem:[#allocation4 + $0x24] sm:$0xf0]  ;;  %v641_v9 = vld [vmem:[#allocation4 + $0x24] sm:$0xf] }
  0x1d   :  { %198 = vmatpush.bf16.msra.mxu0 %v616_v11  ;;  %v568_v10 = vor.u32 %v642_v8, %v567_v7  ;;  %v569_v11 = vld [vmem:[#allocation4 + $0x28] sm:$0xf0]  ;;  %v638_v19 = vld [vmem:[#allocation4 + $0x4] sm:$0xf0] }
  0x1e   :  { %211 = vmatpush.bf16.msra.mxu1 %v624_v12  ;;  %v572_v12 = vor.u32 %v641_v9, %v569_v11 }
  0x1f   :  { %299 = vmatpush.bf16.msra.mxu2 %v632_v24 }
  0x20   :  { %419 = vmatpush.bf16.msra.mxu3 %v592_v44 }
  0x21   :  { %199 = vmatpush.bf16.msra.mxu0 %v615_v13  ;;  %v559_v13 = vld [vmem:[#allocation4 + $0x10] sm:$0xf] }
  0x22   :  { %212 = vmatpush.bf16.msra.mxu1 %v623_v14  ;;  %v640_v14 = vld [vmem:[#allocation4 + $0x14] sm:$0xf0] }
  0x23   :  { %300 = vmatpush.bf16.msra.mxu2 %v631_v25  ;;  %v660_v25 = vld [vmem:[%s842_s4] ss:$0 sm:$0xff] }
  0x24   :  { %420 = vmatpush.bf16.msra.mxu3 %v584_v62 }
  0x25   :  { %200 = vmatpush.bf16.msra.mxu0 %v614_v15  ;;  %v639_v15 = vld [vmem:[#allocation4 + $0x14] sm:$0xf] }
  0x26   :  { %213 = vmatpush.bf16.msra.mxu1 %v622_v16  ;;  %v560_v16 = vor.u32 %v640_v14, %v559_v13 }
  0x27   :  { %301 = vmatpush.bf16.msra.mxu2 %v630_v26 }
  0x28   :  { %421 = vmatpush.bf16.msra.mxu3 %v576_v4 }
  0x29   :  { %201 = vmatpush.bf16.msra.mxu0 %v613_v17  ;;  %v561_v17 = vld [vmem:[#allocation4 + $0x18] sm:$0xf0] }
  0x2a   :  { %214 = vmatpush.bf16.msra.mxu1 %v621_v18  ;;  %v551_v18 = vld [vmem:[#allocation4] sm:$0xf]  ;;  %v564_v20 = vor.u32 %v639_v15, %v561_v17 }
  0x2b   :  { %302 = vmatpush.bf16.msra.mxu2 %v629_v27  ;;  %v552_v23 = vor.u32 %v638_v19, %v551_v18 }
  0x2c   :  { %202 = vmatmul.bf16.vlgmr.msra.gmra.mxu0 %v93_v21  ;;  %422 = vmatpush.bf16.msra.mxu3 %v568_v10  ;;  %v637_v21 = vld [vmem:[#allocation4 + $0x4] sm:$0xf] }
  0x2d   :  { %215 = vmatmul.bf16.vlgmr.msra.gmra.mxu1 %v94_v22  ;;  %430 = vmatpush.bf16.msrb.mxu0 %v612_v35  ;;  %v553_v22 = vld [vmem:[#allocation4 + $0x8] sm:$0xf0]  ;;  %v330_v35 = vld [vmem:[%s844_s6] sm:$0x3] }
  0x2e   :  { %v556_v24 = vor.u32 %v637_v21, %v553_v22  ;;  %v334_v36 = vperm.slane %v330_v35, 1 }
  0x30   :  { %423 = vmatpush.bf16.msra.mxu3 %v560_v16 }
  0x31   :  { %431 = vmatpush.bf16.msrb.mxu0 %v604_v39  ;;  %v333_v39 = vperm.slane %v330_v35, 0 }
  0x34   :  { %424 = vmatpush.bf16.msra.mxu3 %v552_v23 }
  0x35   :  { %432 = vmatpush.bf16.msrb.mxu0 %v596_v46 }
  0x39   :  { %433 = vmatpush.bf16.msrb.mxu0 %v588_v0 }
  0x3d   :  { %434 = vmatpush.bf16.msrb.mxu0 %v580_v6 }
  0x41   :  { %435 = vmatpush.bf16.msrb.mxu0 %v572_v12 }
  0x45   :  { %436 = vmatpush.bf16.msrb.mxu0 %v564_v20 }
  0x49   :  { %437 = vmatpush.bf16.msrb.mxu0 %v556_v24 }
  0xa9   :  { %v203_v47 = vpop.f32.mrf.mxu0 }
  0xaa   :  { %v216_v48 = vpop.f32.mrf.mxu1  ;;  %v204_v49 = vadd.f32 %v659_v45, %v203_v47 }
  0xac   :  { %v217_v50 = vadd.f32 %v216_v48, %v204_v49 }
  0xae   :  { %v221_v51 = vmin.f32 %v217_v50, 0.0  ;;  %vm220_vm0 = vcmp.gt.f32.partialorder %v217_v50, 0.0 }
  0xb0   :  { %v222_v52 = vmul.f32 1.442695, %v221_v51 }
  0xb1   :  { %v205_v53 = vpop.f32.mrf.mxu0 }
  0xb2   :  { %v218_v54 = vpop.f32.mrf.mxu1  ;;  %661 = vpow2.f32 %v222_v52 }
  0xb8   :  { %v662_v55 = vpop.eup %661 }
  0xb9   :  { %v515_v56 = vadd.f32 -1.0, %v662_v55 }
  0xbb   :  { %v225_v57 = vsel %vm220_vm0, %v217_v50, %v515_v56 }
  0xbc   :  { %v243_v58 = vpack.c.bf16 %v225_v57, %v225_v57 }
  0xbe   :  { %303 = vmatmul.bf16.vlgmr.msra.gmra.mxu2 %v243_v58 }
 0x141   :  { %v304_v26 = vpop.f32.mrf.mxu2 }
 0x142   :  { %v305_v27 = vadd.f32 %v660_v25, %v304_v26 }
 0x144   :  { %v309_v28 = vmin.f32 %v305_v27, 0.0  ;;  %vm308_vm1 = vcmp.gt.f32.partialorder %v305_v27, 0.0 }
 0x146   :  { %v310_v29 = vmul.f32 1.442695, %v309_v28 }
 0x148   :  { %663 = vpow2.f32 %v310_v29 }
 0x149   :  { %v306_v30 = vpop.f32.mrf.mxu2 }
 0x14e   :  { %v664_v31 = vpop.eup %663 }
 0x14f   :  { %v548_v32 = vadd.f32 -1.0, %v664_v31 }
 0x151   :  { %v313_v33 = vsel %vm308_vm1, %v305_v27, %v548_v32 }
 0x152   :  { %v331_v34 = vpack.c.bf16 %v313_v33, %v313_v33 }
 0x154   :  { %425 = vmatmul.bf16.vlgmr.msra.gmra.mxu3 %v331_v34  ;;  %438 = vmatmul.bf16.vlgmr.msrb.gmra.mxu0 %v331_v34 }
 0x1d1   :  { %v439_v37 = vpop.f32.mrf.mxu0 }
 0x1d2   :  { %v440_v38 = vadd.f32 %v439_v37, %v334_v36 }
 0x1d4   :  { %444 = vst [vmem:[%s845_s7 + $0x8] sm:$0xff] %v440_v38 }
 0x1d7   :  { %v426_v40 = vpop.f32.mrf.mxu3 }
 0x1d8   :  { %v427_v41 = vadd.f32 %v426_v40, %v333_v39 }
 0x1d9   :  { %v441_v42 = vpop.f32.mrf.mxu0 }
 0x1da   :  { %443 = vst [vmem:[%s845_s7] sm:$0xff] %v427_v41 }
 0x1df   :  { %v428_v43 = vpop.f32.mrf.mxu3 }
 0x1e0   :  { %449 = vsyncpa [#allocation3], 1 }
 0x1e1   :  { %450 = vsyncpa [#allocation5], 1 }

</bundles_post_ra>
